<compile_context>
chip_gen: v5e
topology: v5e:2x2
jax: 0.10.0
libtpu: 0.0.40
codegen_flags: <defaults>
</compile_context>

<pallas_src>
import jax
import jax.numpy as jnp
from jax.experimental import pallas as pl
from jax.experimental.pallas import tpu as pltpu


def _round_up(x, m):
    return ((x + m - 1) // m) * m


def _mlp_kernel(x_ref, w1_ref, b1_ref, w2_ref, b2_ref, o_ref):
    # x_ref : (tn, H)    f32      w1_ref: (H, H2p)  bf16   b1_ref: (1, H2p) f32
    # w2_ref: (H2p, H)   bf16     b2_ref: (1, H)    f32    o_ref : (tn, H)  f32
    x = x_ref[...].astype(jnp.bfloat16)
    h = jnp.dot(x, w1_ref[...], preferred_element_type=jnp.float32) + b1_ref[...]
    h = jnp.maximum(h, 0.0)
    y = jnp.dot(h.astype(jnp.bfloat16), w2_ref[...],
                preferred_element_type=jnp.float32) + b2_ref[...]
    o_ref[...] = jnp.maximum(y, 0.0).astype(o_ref.dtype)


def hidden2output_mlp(x, w1, b1, w2, b2, *, tile_n=512):
    """Fused  relu(relu(x @ w1 + b1) @ w2 + b2)  Pallas kernel.

    x : (N, H) float32
    w1: (H, 2H)   b1: (1, 2H)
    w2: (2H, H)   b2: (1, H)
    Matmuls are computed in bf16 with f32 accumulation.
    """
    N, H = x.shape
    H2 = w1.shape[1]
    assert w1.shape == (H, H2) and w2.shape == (H2, H)
    assert b1.shape == (1, H2) and b2.shape == (1, H)

    # Weights/biases: cast to bf16 (MXU inputs) / f32 (bias add).  Pad the
    # hidden-expansion dim (2H) up to a lane multiple so the intermediate
    # activation is lane-aligned.  Padded columns of W1 / rows of W2 are zero,
    # so results are unchanged (relu(0 + 0) = 0 contributes nothing).
    H2p = _round_up(H2, 128)
    w1b = w1.astype(jnp.bfloat16)
    w2b = w2.astype(jnp.bfloat16)
    b1f = b1.astype(jnp.float32)
    b2f = b2.astype(jnp.float32)
    if H2p != H2:
        w1b = jnp.zeros((H, H2p), jnp.bfloat16).at[:, :H2].set(w1b)
        b1f = jnp.zeros((1, H2p), jnp.float32).at[:, :H2].set(b1f)
        w2b = jnp.zeros((H2p, H), jnp.bfloat16).at[:H2, :].set(w2b)

    # Row tile: full array when small (block dim == full dim is always legal),
    # otherwise a 512-row tile; a ragged tail block is masked by Pallas and is
    # safe because every output row depends only on its own input row.
    tn = N if N <= tile_n else tile_n
    grid = (pl.cdiv(N, tn),)

    # VMEM budget: single-buffered bf16 weights + double-buffered x/out tiles
    # + the (tn, H2p) f32 intermediate, 2x headroom, clamped under v7x's
    # 64 MiB physical VMEM.
    weight_bytes = (H * H2p + H2p * H) * 2 + (H2p + H) * 4
    tile_bytes = 2 * 2 * (tn * H * 4) + tn * H2p * 4
    vmem_limit = int(min(56 * 1024 * 1024,
                         max(32 * 1024 * 1024, 2 * (weight_bytes + tile_bytes))))

    cost = pl.CostEstimate(
        flops=2 * N * H * H2 * 2,               # two matmuls
        transcendentals=0,
        bytes_accessed=2 * N * H * 4 + weight_bytes,
    )

    def build(single_buffer_weights):
        # Resident operands (constant index_map): single-buffer to halve their
        # VMEM footprint (they are only DMA'd once anyway since their block
        # index never changes); x/out tiles keep default double buffering.
        kw = dict(pipeline_mode=pl.Buffered(1)) if single_buffer_weights else {}
        return pl.pallas_call(
            _mlp_kernel,
            out_shape=jax.ShapeDtypeStruct((N, H), x.dtype),
            grid_spec=pltpu.PrefetchScalarGridSpec(
                num_scalar_prefetch=0,
                grid=grid,
                in_specs=[
                    pl.BlockSpec((tn, H), lambda i: (i, 0)),          # x row tile
                    pl.BlockSpec((H, H2p), lambda i: (0, 0), **kw),   # W1 (resident)
                    pl.BlockSpec((1, H2p), lambda i: (0, 0), **kw),   # b1
                    pl.BlockSpec((H2p, H), lambda i: (0, 0), **kw),   # W2 (resident)
                    pl.BlockSpec((1, H), lambda i: (0, 0), **kw),     # b2
                ],
                out_specs=pl.BlockSpec((tn, H), lambda i: (i, 0)),
            ),
            compiler_params=pltpu.CompilerParams(
                dimension_semantics=("parallel",),
                vmem_limit_bytes=vmem_limit,
            ),
            cost_estimate=cost,
        )

    try:
        out = build(True)(x, w1b, b1f, w2b, b2f)
    except Exception:
        # Fallback: default double-buffered weights if this jax/Mosaic build
        # rejects pipeline_mode=pl.Buffered(1).
        out = build(False)(x, w1b, b1f, w2b, b2f)

    return out


def reference_mlp_bf16(x, w1, b1, w2, b2):
    """Same compute path as the kernel: bf16 matmuls, f32 accumulation."""
    h = jnp.dot(x.astype(jnp.bfloat16), w1.astype(jnp.bfloat16),
                preferred_element_type=jnp.float32) + b1
    h = jnp.maximum(h, 0.0)
    y = jnp.dot(h.astype(jnp.bfloat16), w2.astype(jnp.bfloat16),
                preferred_element_type=jnp.float32) + b2
    return jnp.maximum(y, 0.0)


def reference_mlp_f32(x, w1, b1, w2, b2):
    h = jnp.maximum(x @ w1 + b1, 0.0)
    return jnp.maximum(h @ w2 + b2, 0.0)


if __name__ == "__main__":
    # Small shapes consistent with the module: batch=2, seq=8, hidden=32.
    batch, seq, hidden = 2, 8, 32
    n_rows = batch * seq          # flattened token axis
    h2 = 2 * hidden

    key = jax.random.PRNGKey(0)
    kx, k1, k2, k3, k4 = jax.random.split(key, 5)

    x = jax.random.normal(kx, (n_rows, hidden), dtype=jnp.float32)

    # Deterministic synthetic parameters (shapes follow nn.Linear in __init__,
    # stored pre-transposed for row-major matmuls):
    w1 = (jax.random.normal(k1, (hidden, h2), dtype=jnp.float32)
          * (1.0 / jnp.sqrt(hidden)))
    b1 = jax.random.normal(k2, (1, h2), dtype=jnp.float32) * 0.01
    w2 = (jax.random.normal(k3, (h2, hidden), dtype=jnp.float32)
          * (1.0 / jnp.sqrt(h2)))
    b2 = jax.random.normal(k4, (1, hidden), dtype=jnp.float32) * 0.01

    out = hidden2output_mlp(x, w1, b1, w2, b2)
    out = jax.block_until_ready(out)
    assert out.shape == (n_rows, hidden)

    # Tight check against a reference using the same bf16/f32-acc compute path.
    ref_bf16 = reference_mlp_bf16(x, w1, b1, w2, b2)
    assert jnp.allclose(out, ref_bf16, atol=5e-3, rtol=5e-3), \
        "mismatch vs bf16 reference"

    # Coarse semantic sanity check against the full-f32 PyTorch-equivalent path.
    ref_f32 = reference_mlp_f32(x, w1, b1, w2, b2)
    assert jnp.allclose(out, ref_f32, atol=0.15, rtol=0.15), \
        "mismatch vs f32 reference"

    print("KERNEL_OK")
</pallas_src>

<mosaic_0001>
module attributes {stable_mosaic.version = 11 : i64} {
  func.func @_mlp_kernel(%arg0: i32, %arg1: memref<16x32xf32, #tpu.memory_space<vmem>>, %arg2: memref<32x128xbf16, #tpu.memory_space<vmem>>, %arg3: memref<1x128xf32, #tpu.memory_space<vmem>>, %arg4: memref<128x32xbf16, #tpu.memory_space<vmem>>, %arg5: memref<1x32xf32, #tpu.memory_space<vmem>>, %arg6: memref<16x32xf32, #tpu.memory_space<vmem>>) attributes {dimension_semantics = [#tpu.dimension_semantics<parallel>], iteration_bounds = array<i64: 1>, scalar_prefetch = 0 : i64, scratch_operands = 0 : i64, tpu.core_type = #tpu.core_type<tc>, window_params = [{transform_indices = @transform_0, window_bounds = array<i64: 16, 32>}, {pipeline_mode = #tpu.pipeline_mode<synchronous>, transform_indices = @transform_1, window_bounds = array<i64: 32, 128>}, {pipeline_mode = #tpu.pipeline_mode<synchronous>, transform_indices = @transform_2, window_bounds = array<i64: 1, 128>}, {pipeline_mode = #tpu.pipeline_mode<synchronous>, transform_indices = @transform_3, window_bounds = array<i64: 128, 32>}, {pipeline_mode = #tpu.pipeline_mode<synchronous>, transform_indices = @transform_4, window_bounds = array<i64: 1, 32>}, {transform_indices = @transform_5, window_bounds = array<i64: 16, 32>}]} {
    %c0 = arith.constant 0 : index
    %c0_0 = arith.constant 0 : index
    %0 = vector.load %arg1[%c0, %c0_0] : memref<16x32xf32, #tpu.memory_space<vmem>>, vector<16x32xf32>
    %1 = arith.truncf %0 : vector<16x32xf32> to vector<16x32xbf16>
    %c0_1 = arith.constant 0 : index
    %c0_2 = arith.constant 0 : index
    %2 = vector.load %arg2[%c0_1, %c0_2] : memref<32x128xbf16, #tpu.memory_space<vmem>>, vector<32x128xbf16>
    %cst = arith.constant dense<0.000000e+00> : vector<16x128xf32>
    %3 = tpu.matmul %1, %2, %cst {dimension_numbers = #tpu.dot_dimension_numbers<[1], [0], [0], [1], [0, 0, 1, 1], [], []>} : vector<16x32xbf16>, vector<32x128xbf16>, vector<16x128xf32> -> vector<16x128xf32>
    %c0_3 = arith.constant 0 : index
    %c0_4 = arith.constant 0 : index
    %4 = vector.load %arg3[%c0_3, %c0_4] : memref<1x128xf32, #tpu.memory_space<vmem>>, vector<1x128xf32>
    %5 = vector.broadcast %4 : vector<1x128xf32> to vector<16x128xf32>
    %6 = arith.addf %3, %5 : vector<16x128xf32>
    %cst_5 = arith.constant 0.000000e+00 : f32
    %7 = vector.broadcast %cst_5 : f32 to vector<16x128xf32>
    %8 = arith.maximumf %6, %7 : vector<16x128xf32>
    %9 = arith.truncf %8 : vector<16x128xf32> to vector<16x128xbf16>
    %c0_6 = arith.constant 0 : index
    %c0_7 = arith.constant 0 : index
    %10 = vector.load %arg4[%c0_6, %c0_7] : memref<128x32xbf16, #tpu.memory_space<vmem>>, vector<128x32xbf16>
    %cst_8 = arith.constant dense<0.000000e+00> : vector<16x32xf32>
    %11 = tpu.matmul %9, %10, %cst_8 {dimension_numbers = #tpu.dot_dimension_numbers<[1], [0], [0], [1], [0, 0, 1, 1], [], []>} : vector<16x128xbf16>, vector<128x32xbf16>, vector<16x32xf32> -> vector<16x32xf32>
    %c0_9 = arith.constant 0 : index
    %c0_10 = arith.constant 0 : index
    %12 = vector.load %arg5[%c0_9, %c0_10] : memref<1x32xf32, #tpu.memory_space<vmem>>, vector<1x32xf32>
    %13 = vector.broadcast %12 : vector<1x32xf32> to vector<16x32xf32>
    %14 = arith.addf %11, %13 : vector<16x32xf32>
    %cst_11 = arith.constant 0.000000e+00 : f32
    %15 = vector.broadcast %cst_11 : f32 to vector<16x32xf32>
    %16 = arith.maximumf %14, %15 : vector<16x32xf32>
    %c0_12 = arith.constant 0 : index
    %c0_13 = arith.constant 0 : index
    %17 = vector.load %arg6[%c0_12, %c0_13] : memref<16x32xf32, #tpu.memory_space<vmem>>, vector<16x32xf32>
    tpu.vector_store %arg6[%c0_12, %c0_13], %16 {strides = array<i32>} : memref<16x32xf32, #tpu.memory_space<vmem>>, vector<16x32xf32>,
    return
  }
  func.func @transform_0(%arg0: i32) -> (i32, i32) {
    %c0_i32 = arith.constant 0 : i32
    %c0_i32_0 = arith.constant 0 : i32
    return %arg0, %c0_i32 : i32, i32
  }
  func.func @transform_1(%arg0: i32) -> (i32, i32) {
    %c0_i32 = arith.constant 0 : i32
    %c0_i32_0 = arith.constant 0 : i32
    %c0_i32_1 = arith.constant 0 : i32
    return %c0_i32, %c0_i32_0 : i32, i32
  }
  func.func @transform_2(%arg0: i32) -> (i32, i32) {
    %c0_i32 = arith.constant 0 : i32
    %c0_i32_0 = arith.constant 0 : i32
    %c0_i32_1 = arith.constant 0 : i32
    return %c0_i32, %c0_i32_0 : i32, i32
  }
  func.func @transform_3(%arg0: i32) -> (i32, i32) {
    %c0_i32 = arith.constant 0 : i32
    %c0_i32_0 = arith.constant 0 : i32
    %c0_i32_1 = arith.constant 0 : i32
    return %c0_i32, %c0_i32_0 : i32, i32
  }
  func.func @transform_4(%arg0: i32) -> (i32, i32) {
    %c0_i32 = arith.constant 0 : i32
    %c0_i32_0 = arith.constant 0 : i32
    %c0_i32_1 = arith.constant 0 : i32
    return %c0_i32, %c0_i32_0 : i32, i32
  }
  func.func @transform_5(%arg0: i32) -> (i32, i32) {
    %c0_i32 = arith.constant 0 : i32
    %c0_i32_0 = arith.constant 0 : i32
    return %arg0, %c0_i32 : i32, i32
  }
}

module attributes {stable_mosaic.version = 11 : i64} {
  func.func @_mlp_kernel(%arg0: i32, %arg1: memref<16x32xf32, #tpu.memory_space<vmem>>, %arg2: memref<32x128xbf16, #tpu.memory_space<vmem>>, %arg3: memref<1x128xf32, #tpu.memory_space<vmem>>, %arg4: memref<128x32xbf16, #tpu.memory_space<vmem>>, %arg5: memref<1x32xf32, #tpu.memory_space<vmem>>, %arg6: memref<16x32xf32, #tpu.memory_space<vmem>>) attributes {dimension_semantics = [#tpu.dimension_semantics<parallel>], iteration_bounds = array<i64: 1>, scalar_prefetch = 0 : i64, scratch_operands = 0 : i64, tpu.core_type = #tpu.core_type<tc>, window_params = [{transform_indices = @transform_0, window_bounds = array<i64: 16, 32>}, {pipeline_mode = #tpu.pipeline_mode<synchronous>, transform_indices = @transform_1, window_bounds = array<i64: 32, 128>}, {pipeline_mode = #tpu.pipeline_mode<synchronous>, transform_indices = @transform_2, window_bounds = array<i64: 1, 128>}, {pipeline_mode = #tpu.pipeline_mode<synchronous>, transform_indices = @transform_3, window_bounds = array<i64: 128, 32>}, {pipeline_mode = #tpu.pipeline_mode<synchronous>, transform_indices = @transform_4, window_bounds = array<i64: 1, 32>}, {transform_indices = @transform_5, window_bounds = array<i64: 16, 32>}]} {
    %c0 = arith.constant 0 : index
    %c0_0 = arith.constant 0 : index
    %0 = vector.load %arg1[%c0, %c0_0] : memref<16x32xf32, #tpu.memory_space<vmem>>, vector<16x32xf32>
    %1 = arith.truncf %0 : vector<16x32xf32> to vector<16x32xbf16>
    %c0_1 = arith.constant 0 : index
    %c0_2 = arith.constant 0 : index
    %2 = vector.load %arg2[%c0_1, %c0_2] : memref<32x128xbf16, #tpu.memory_space<vmem>>, vector<32x128xbf16>
    %cst = arith.constant dense<0.000000e+00> : vector<16x128xf32>
    %3 = tpu.matmul %1, %2, %cst {dimension_numbers = #tpu.dot_dimension_numbers<[1], [0], [0], [1], [0, 0, 1, 1], [], []>} : vector<16x32xbf16>, vector<32x128xbf16>, vector<16x128xf32> -> vector<16x128xf32>
    %c0_3 = arith.constant 0 : index
    %c0_4 = arith.constant 0 : index
    %4 = vector.load %arg3[%c0_3, %c0_4] : memref<1x128xf32, #tpu.memory_space<vmem>>, vector<1x128xf32>
    %5 = vector.broadcast %4 : vector<1x128xf32> to vector<16x128xf32>
    %6 = arith.addf %3, %5 : vector<16x128xf32>
    %cst_5 = arith.constant 0.000000e+00 : f32
    %7 = vector.broadcast %cst_5 : f32 to vector<16x128xf32>
    %8 = arith.maximumf %6, %7 : vector<16x128xf32>
    %9 = arith.truncf %8 : vector<16x128xf32> to vector<16x128xbf16>
    %c0_6 = arith.constant 0 : index
    %c0_7 = arith.constant 0 : index
    %10 = vector.load %arg4[%c0_6, %c0_7] : memref<128x32xbf16, #tpu.memory_space<vmem>>, vector<128x32xbf16>
    %cst_8 = arith.constant dense<0.000000e+00> : vector<16x32xf32>
    %11 = tpu.matmul %9, %10, %cst_8 {dimension_numbers = #tpu.dot_dimension_numbers<[1], [0], [0], [1], [0, 0, 1, 1], [], []>} : vector<16x128xbf16>, vector<128x32xbf16>, vector<16x32xf32> -> vector<16x32xf32>
    %c0_9 = arith.constant 0 : index
    %c0_10 = arith.constant 0 : index
    %12 = vector.load %arg5[%c0_9, %c0_10] : memref<1x32xf32, #tpu.memory_space<vmem>>, vector<1x32xf32>
    %13 = vector.broadcast %12 : vector<1x32xf32> to vector<16x32xf32>
    %14 = arith.addf %11, %13 : vector<16x32xf32>
    %cst_11 = arith.constant 0.000000e+00 : f32
    %15 = vector.broadcast %cst_11 : f32 to vector<16x32xf32>
    %16 = arith.maximumf %14, %15 : vector<16x32xf32>
    %c0_12 = arith.constant 0 : index
    %c0_13 = arith.constant 0 : index
    %17 = vector.load %arg6[%c0_12, %c0_13] : memref<16x32xf32, #tpu.memory_space<vmem>>, vector<16x32xf32>
    tpu.vector_store %arg6[%c0_12, %c0_13], %16 {strides = array<i32>} : memref<16x32xf32, #tpu.memory_space<vmem>>, vector<16x32xf32>,
    return
  }
  func.func @transform_0(%arg0: i32) -> (i32, i32) {
    %c0_i32 = arith.constant 0 : i32
    %c0_i32_0 = arith.constant 0 : i32
    return %arg0, %c0_i32 : i32, i32
  }
  func.func @transform_1(%arg0: i32) -> (i32, i32) {
    %c0_i32 = arith.constant 0 : i32
    %c0_i32_0 = arith.constant 0 : i32
    %c0_i32_1 = arith.constant 0 : i32
    return %c0_i32, %c0_i32_0 : i32, i32
  }
  func.func @transform_2(%arg0: i32) -> (i32, i32) {
    %c0_i32 = arith.constant 0 : i32
    %c0_i32_0 = arith.constant 0 : i32
    %c0_i32_1 = arith.constant 0 : i32
    return %c0_i32, %c0_i32_0 : i32, i32
  }
  func.func @transform_3(%arg0: i32) -> (i32, i32) {
    %c0_i32 = arith.constant 0 : i32
    %c0_i32_0 = arith.constant 0 : i32
    %c0_i32_1 = arith.constant 0 : i32
    return %c0_i32, %c0_i32_0 : i32, i32
  }
  func.func @transform_4(%arg0: i32) -> (i32, i32) {
    %c0_i32 = arith.constant 0 : i32
    %c0_i32_0 = arith.constant 0 : i32
    %c0_i32_1 = arith.constant 0 : i32
    return %c0_i32, %c0_i32_0 : i32, i32
  }
  func.func @transform_5(%arg0: i32) -> (i32, i32) {
    %c0_i32 = arith.constant 0 : i32
    %c0_i32_0 = arith.constant 0 : i32
    return %arg0, %c0_i32 : i32, i32
  }
}

</mosaic_0001>

<bundles_post_ra>
// kernel: tpu_custom_call.1
= control target key start
LH: loop header
LB: loop body
LE: loop exit
PB: predicated region body
PF: predicated region fallthrough
CT: control target
= control target key end

     0   :  { %s333_s0 = inlined_call_operand.vmem [shape: f32[16,32], index: 0, kind: input, shape index: {}]   ;;  %s334_s1 = inlined_call_operand.vmem [shape: bf16[32,128], index: 1, kind: input, shape index: {}]   ;;  %s335_s2 = inlined_call_operand.vmem [shape: f32[1,128], index: 2, kind: input, shape index: {}]   ;;  %s336_s3 = inlined_call_operand.vmem [shape: bf16[128,32], index: 3, kind: input, shape index: {}]   ;;  %s337_s4 = inlined_call_operand.vmem [shape: f32[1,32], index: 4, kind: input, shape index: {}]   ;;  %s338_s5 = inlined_call_operand.hbm [shape: f32[16,32], index: 5, kind: output, shape index: {}]  }
   0x1   :  { %v212_v0 = vld [vmem:[%s334_s1 + $0x8] sm:$0xff]  ;;  %v211_v1 = vld [vmem:[%s334_s1] sm:$0xff]  ;;  %v220_v2 = vld [vmem:[%s336_s3 + $0x38] sm:$0xff] }
   0x2   :  { %55 = vmatpush.bf16.msra.mxu0 %v212_v0  ;;  %v22_v3 = vld [vmem:[%s333_s0] sm:$0xff]  ;;  %v23_v4 = vld [vmem:[%s333_s0 + $0x8] sm:$0xff]  ;;  %134 = vmatpush.bf16.msra.mxu1 %v220_v2  ;;  %v219_v5 = vld [vmem:[%s336_s3 + $0x30] sm:$0xff] }
   0x3   :  { %10 = vsyncpa [#allocation3], 0  ;;  %v24_v6 = vpack.c.bf16 %v23_v4, %v22_v3  ;;  %vm45_vm0 = vcmask 261120   ;;  %v218_v7 = vld [vmem:[%s336_s3 + $0x28] sm:$0xff]  ;;  %v217_v8 = vld [vmem:[%s336_s3 + $0x20] sm:$0xff]  ;;  %s158_s21 = sshll.u32 %s338_s5, 4  ;;  %s159_s21 = int_to_ptr.hbm [resolvable:$true] %s158_s21 }
   0x4   :  { %v216_v9 = vld [vmem:[%s336_s3 + $0x18] sm:$0xff]  ;;  %v215_v10 = vld [vmem:[%s336_s3 + $0x10] sm:$0xff]  ;;  %v214_v11 = vld [vmem:[%s336_s3 + $0x8] sm:$0xff]  ;;  %s253_s22 = smov 128  }
   0x5   :  { %v213_v12 = vld [vmem:[%s336_s3] sm:$0xff]  ;;  %s252_s3 = smov [#allocation2]  }
   0x6   :  { %56 = vmatpush.bf16.msra.mxu0 %v211_v1  ;;  %135 = vmatpush.bf16.msra.mxu1 %v219_v5  ;;  %v224_v14 = vld [vmem:[%s335_s2] ss:$0 sm:$0xff]  ;;  %s156_s19 = sshll.u32 %s252_s3, 4  ;;  %s157_s19 = int_to_ptr.vmem [resolvable:$true] %s156_s19 }
   0x7   :  { %v225_v21 = vld [vmem:[%s337_s4] ss:$0 sm:$0xff]  ;;  %s254_s4 = smov 8  }
   0x9   :  { %178 = vmatmul.msk.bf16.vlgmr.msra.gmra.mxu0 %vm45_vm0, %v24_v6 }
   0xa   :  { %136 = vmatpush.bf16.msra.mxu1 %v218_v7 }
   0xe   :  { %137 = vmatpush.bf16.msra.mxu1 %v217_v8 }
  0x12   :  { %138 = vmatpush.bf16.msra.mxu1 %v216_v9 }
  0x16   :  { %139 = vmatpush.bf16.msra.mxu1 %v215_v10 }
  0x1a   :  { %140 = vmatpush.bf16.msra.mxu1 %v214_v11 }
  0x1e   :  { %141 = vmatpush.bf16.msra.mxu1 %v213_v12 }
  0x86   :  { %v58_v13 = vpop.f32.mrf.mxu0 }
  0x87   :  { %v59_v15 = vadd.f32 %v224_v14, %v58_v13 }
  0x89   :  { %v63_v18 = vmax.f32 %v59_v15, 0.0 }
  0x8e   :  { %v60_v16 = vpop.f32.mrf.mxu0 }
  0x8f   :  { %v61_v17 = vadd.f32 %v224_v14, %v60_v16 }
  0x91   :  { %v64_v19 = vmax.f32 %v61_v17, 0.0 }
  0x93   :  { %v65_v20 = vpack.c.bf16 %v64_v19, %v63_v18 }
  0x95   :  { %142 = vmatmul.bf16.vlgmr.msra.gmra.mxu1 %v65_v20 }
 0x112   :  { %v143_v22 = vpop.f32.mrf.mxu1 }
 0x113   :  { %v144_v23 = vadd.f32 %v225_v21, %v143_v22 }
 0x115   :  { %v148_v24 = vmax.f32 %v144_v23, 0.0 }
 0x117   :  { %150 = vst.msk [vmem:[#allocation2] sm:$0xff] %vm45_vm0, %v148_v24 }
 0x11a   :  { %v145_v25 = vpop.f32.mrf.mxu1 }
 0x11b   :  { %v146_v26 = vadd.f32 %v225_v21, %v145_v25 }
 0x11d   :  { %v149_v27 = vmax.f32 %v146_v26, 0.0 }
 0x11f   :  { %151 = vst.msk [vmem:[#allocation2 + $0x8] sm:$0xff] %vm45_vm0, %v149_v27 }
 0x120   :  { %164 = dma.vmem_to_hbm [thread:$0]  %s157_s19, 256, %s159_s21, [#allocation3], %s253_s22, %s253_s22, %s254_s4  }
 0x121   :  { %250 = dma.done.wait [#allocation3], 256  }
 0x122   :  { %251 = vsyncadd [#allocation3], 4294967040 }
 0x123   :  { %169 = vsyncpa [#allocation3], 1 }

// kernel: tpu_custom_call.1
= control target key start
LH: loop header
LB: loop body
LE: loop exit
PB: predicated region body
PF: predicated region fallthrough
CT: control target
= control target key end

     0   :  { %s333_s0 = inlined_call_operand.vmem [shape: f32[16,32], index: 0, kind: input, shape index: {}]   ;;  %s334_s1 = inlined_call_operand.vmem [shape: bf16[32,128], index: 1, kind: input, shape index: {}]   ;;  %s335_s2 = inlined_call_operand.vmem [shape: f32[1,128], index: 2, kind: input, shape index: {}]   ;;  %s336_s3 = inlined_call_operand.vmem [shape: bf16[128,32], index: 3, kind: input, shape index: {}]   ;;  %s337_s4 = inlined_call_operand.vmem [shape: f32[1,32], index: 4, kind: input, shape index: {}]   ;;  %s338_s5 = inlined_call_operand.hbm [shape: f32[16,32], index: 5, kind: output, shape index: {}]  }
   0x1   :  { %v212_v0 = vld [vmem:[%s334_s1 + $0x8] sm:$0xff]  ;;  %v211_v1 = vld [vmem:[%s334_s1] sm:$0xff]  ;;  %v220_v2 = vld [vmem:[%s336_s3 + $0x38] sm:$0xff] }
   0x2   :  { %55 = vmatpush.bf16.msra.mxu0 %v212_v0  ;;  %v22_v3 = vld [vmem:[%s333_s0] sm:$0xff]  ;;  %v23_v4 = vld [vmem:[%s333_s0 + $0x8] sm:$0xff]  ;;  %134 = vmatpush.bf16.msra.mxu1 %v220_v2  ;;  %v219_v5 = vld [vmem:[%s336_s3 + $0x30] sm:$0xff] }
   0x3   :  { %10 = vsyncpa [#allocation3], 0  ;;  %v24_v6 = vpack.c.bf16 %v23_v4, %v22_v3  ;;  %vm45_vm0 = vcmask 261120   ;;  %v218_v7 = vld [vmem:[%s336_s3 + $0x28] sm:$0xff]  ;;  %v217_v8 = vld [vmem:[%s336_s3 + $0x20] sm:$0xff]  ;;  %s158_s21 = sshll.u32 %s338_s5, 4  ;;  %s159_s21 = int_to_ptr.hbm [resolvable:$true] %s158_s21 }
   0x4   :  { %v216_v9 = vld [vmem:[%s336_s3 + $0x18] sm:$0xff]  ;;  %v215_v10 = vld [vmem:[%s336_s3 + $0x10] sm:$0xff]  ;;  %v214_v11 = vld [vmem:[%s336_s3 + $0x8] sm:$0xff]  ;;  %s253_s22 = smov 128  }
   0x5   :  { %v213_v12 = vld [vmem:[%s336_s3] sm:$0xff]  ;;  %s252_s3 = smov [#allocation2]  }
   0x6   :  { %56 = vmatpush.bf16.msra.mxu0 %v211_v1  ;;  %135 = vmatpush.bf16.msra.mxu1 %v219_v5  ;;  %v224_v14 = vld [vmem:[%s335_s2] ss:$0 sm:$0xff]  ;;  %s156_s19 = sshll.u32 %s252_s3, 4  ;;  %s157_s19 = int_to_ptr.vmem [resolvable:$true] %s156_s19 }
   0x7   :  { %v225_v21 = vld [vmem:[%s337_s4] ss:$0 sm:$0xff]  ;;  %s254_s4 = smov 8  }
   0x9   :  { %178 = vmatmul.msk.bf16.vlgmr.msra.gmra.mxu0 %vm45_vm0, %v24_v6 }
   0xa   :  { %136 = vmatpush.bf16.msra.mxu1 %v218_v7 }
   0xe   :  { %137 = vmatpush.bf16.msra.mxu1 %v217_v8 }
  0x12   :  { %138 = vmatpush.bf16.msra.mxu1 %v216_v9 }
  0x16   :  { %139 = vmatpush.bf16.msra.mxu1 %v215_v10 }
  0x1a   :  { %140 = vmatpush.bf16.msra.mxu1 %v214_v11 }
  0x1e   :  { %141 = vmatpush.bf16.msra.mxu1 %v213_v12 }
  0x86   :  { %v58_v13 = vpop.f32.mrf.mxu0 }
  0x87   :  { %v59_v15 = vadd.f32 %v224_v14, %v58_v13 }
  0x89   :  { %v63_v18 = vmax.f32 %v59_v15, 0.0 }
  0x8e   :  { %v60_v16 = vpop.f32.mrf.mxu0 }
  0x8f   :  { %v61_v17 = vadd.f32 %v224_v14, %v60_v16 }
  0x91   :  { %v64_v19 = vmax.f32 %v61_v17, 0.0 }
  0x93   :  { %v65_v20 = vpack.c.bf16 %v64_v19, %v63_v18 }
  0x95   :  { %142 = vmatmul.bf16.vlgmr.msra.gmra.mxu1 %v65_v20 }
 0x112   :  { %v143_v22 = vpop.f32.mrf.mxu1 }
 0x113   :  { %v144_v23 = vadd.f32 %v225_v21, %v143_v22 }
 0x115   :  { %v148_v24 = vmax.f32 %v144_v23, 0.0 }
 0x117   :  { %150 = vst.msk [vmem:[#allocation2] sm:$0xff] %vm45_vm0, %v148_v24 }
 0x11a   :  { %v145_v25 = vpop.f32.mrf.mxu1 }
 0x11b   :  { %v146_v26 = vadd.f32 %v225_v21, %v145_v25 }
 0x11d   :  { %v149_v27 = vmax.f32 %v146_v26, 0.0 }
 0x11f   :  { %151 = vst.msk [vmem:[#allocation2 + $0x8] sm:$0xff] %vm45_vm0, %v149_v27 }
 0x120   :  { %164 = dma.vmem_to_hbm [thread:$0]  %s157_s19, 256, %s159_s21, [#allocation3], %s253_s22, %s253_s22, %s254_s4  }
 0x121   :  { %250 = dma.done.wait [#allocation3], 256  }
 0x122   :  { %251 = vsyncadd [#allocation3], 4294967040 }
 0x123   :  { %169 = vsyncpa [#allocation3], 1 }

</bundles_post_ra>
